<compile_context>
chip_gen: v7x
topology: tpu7x:2x2x1
jax: 0.10.0
libtpu: 0.0.40
codegen_flags: <defaults>
</compile_context>

<pallas_src>
import jax
import jax.numpy as jnp
from jax.experimental import pallas as pl
from jax.experimental.pallas import tpu as pltpu


def gcn_pool_kernel(a_ref, x_ref, w1_ref, b1_ref, hg_ref):
    """GraphConv (norm='both', dense A_hat) + ReLU + per-graph node-mean pool.

    a_ref : (TB, N, N)   normalized adjacency D^-1/2 A D^-1/2 for TB graphs
    x_ref : (TB, N, Din) node features
    w1_ref: (Din, H), b1_ref: (1, H)
    hg_ref: (TB, H)      pooled (mean over nodes) hidden features
    """
    TB, N, _ = a_ref.shape
    Din = x_ref.shape[-1]
    H = w1_ref.shape[-1]

    a = a_ref[...]
    x = x_ref[...]
    w1 = w1_ref[...]
    b1 = b1_ref[...]

    if Din < H:
        # (A @ X) @ W1 : N*N*Din + N*Din*H flops  (cheaper when Din < H)
        ax = jnp.einsum("bnm,bmd->bnd", a, x,
                        preferred_element_type=jnp.float32)           # (TB, N, Din) f32
        h = jnp.dot(ax.reshape(TB * N, Din), w1,
                    preferred_element_type=jnp.float32)                # (TB*N, H) f32
    else:
        # A @ (X @ W1) : N*Din*H + N*N*H flops
        xw = jnp.dot(x.reshape(TB * N, Din).astype(jnp.float32), w1,
                     preferred_element_type=jnp.float32)               # (TB*N, H)
        h = jnp.einsum("bnm,bmh->bnh", a.astype(jnp.float32),
                       xw.reshape(TB, N, H),
                       preferred_element_type=jnp.float32).reshape(TB * N, H)

    h = jnp.maximum(h + b1, 0.0).reshape(TB, N, H)

    # dgl.mean_nodes: mean over the node axis (sublane reduce on the XLU — the
    # XLU slot is idle here, so this is effectively free).
    # TODO(synk): for ragged graphs (< N real nodes per graph) pass per-graph
    # node counts via scalar prefetch and mask + divide by the true count.
    hg_ref[...] = jnp.mean(h, axis=1).astype(hg_ref.dtype)


def gcn_forward(a_hat, x, w1, b1, w2, b2, w3, b3, *, tb=None, use_bf16=False):
    """Full OneConvTwoClassiLayerGCN forward (dense batched-graph form)."""
    B, N, _ = a_hat.shape
    Din = x.shape[-1]
    H = w1.shape[1]

    if tb is None:
        tb = B if B <= 8 else 8          # TB graphs per grid step
    assert B % tb == 0, "batch must be divisible by the per-step graph tile"

    if use_bf16:
        # The adjacency dominates HBM traffic at realistic N; bf16 halves its
        # bytes / VMEM footprint and uses the native bf16 MXU path. In-kernel
        # accumulation stays f32 (preferred_element_type).
        a_hat = a_hat.astype(jnp.bfloat16)
        x = x.astype(jnp.bfloat16)

    hg = pl.pallas_call(
        gcn_pool_kernel,
        out_shape=jax.ShapeDtypeStruct((B, H), jnp.float32),
        grid=(B // tb,),
        in_specs=[
            pl.BlockSpec((tb, N, N), lambda i: (i, 0, 0)),     # a_hat (per-step block)
            pl.BlockSpec((tb, N, Din), lambda i: (i, 0, 0)),   # x     (per-step block)
            pl.BlockSpec((Din, H), lambda i: (0, 0)),          # w1 (resident)
            pl.BlockSpec((1, H), lambda i: (0, 0)),            # b1 (resident)
        ],
        out_specs=pl.BlockSpec((tb, H), lambda i: (i, 0)),     # lane-dense pooled feats
        compiler_params=pltpu.CompilerParams(
            dimension_semantics=("parallel",),   # shards graph batches across v7x's 2 TCs
            vmem_limit_bytes=64 * 1024 * 1024,   # headroom for larger N blocks, fits all gens
        ),
    )(a_hat, x, w1, b1)

    # Tiny classifier Linear(H,12) -> Linear(12,C), batched over all B graphs
    # as plain XLA matmuls (per perf review: pulling these out of the per-graph
    # hot path avoids M=1 MXU pushes and the masked 4-lane output store).
    z = hg @ w2 + b2
    return z @ w3 + b3


def reference_forward(a_hat, x, w1, b1, w2, b2, w3, b3):
    # Mirrors PyTorch/DGL op order: relu(A_hat @ (X @ W1) + b1), mean_nodes, 2 Linears.
    h = jnp.maximum(jnp.einsum("bnm,bmd->bnd", a_hat, x @ w1) + b1, 0.0)
    hg = jnp.mean(h, axis=1)
    z = hg @ w2 + b2
    return z @ w3 + b3


if __name__ == "__main__":
    # Small, deterministic setup: B graphs of N nodes each (batched graph).
    B, N = 2, 16
    in_dim, hidden_dim, mid_dim, n_classes = 8, 32, 12, 4

    key = jax.random.PRNGKey(0)
    k_adj, k_x, k_w1, k_b1, k_w2, k_b2, k_w3, k_b3 = jax.random.split(key, 8)

    # Random undirected graphs with self-loops (nonzero degrees, as GraphConv
    # with norm='both' requires).
    raw = jax.random.uniform(k_adj, (B, N, N))
    adj = (raw + jnp.swapaxes(raw, 1, 2) > 1.2).astype(jnp.float32)
    adj = jnp.minimum(adj + jnp.eye(N, dtype=jnp.float32)[None], 1.0)

    # Symmetric normalization D^-1/2 A D^-1/2 (GraphConv norm='both').
    deg = jnp.sum(adj, axis=-1)
    d_inv_sqrt = 1.0 / jnp.sqrt(deg)
    a_hat = adj * d_inv_sqrt[:, :, None] * d_inv_sqrt[:, None, :]

    x = jax.random.normal(k_x, (B, N, in_dim), dtype=jnp.float32)

    # Deterministic synthetic parameters.
    w1 = jax.random.normal(k_w1, (in_dim, hidden_dim), jnp.float32) * 0.1
    b1 = jax.random.normal(k_b1, (1, hidden_dim), jnp.float32) * 0.1
    w2 = jax.random.normal(k_w2, (hidden_dim, mid_dim), jnp.float32) * 0.1
    b2 = jax.random.normal(k_b2, (1, mid_dim), jnp.float32) * 0.1
    w3 = jax.random.normal(k_w3, (mid_dim, n_classes), jnp.float32) * 0.1
    b3 = jax.random.normal(k_b3, (1, n_classes), jnp.float32) * 0.1

    ref = reference_forward(a_hat, x, w1, b1, w2, b2, w3, b3)

    # f32 path: tight tolerance.
    out = jax.block_until_ready(gcn_forward(a_hat, x, w1, b1, w2, b2, w3, b3))
    assert out.shape == (B, n_classes)
    assert jnp.allclose(out, ref, atol=1e-5, rtol=1e-5), (out, ref)

    # bf16-adjacency fast path (HBM-bound regime at realistic N): looser tolerance.
    out_bf16 = jax.block_until_ready(
        gcn_forward(a_hat, x, w1, b1, w2, b2, w3, b3, use_bf16=True))
    assert jnp.allclose(out_bf16, ref, atol=2e-2, rtol=2e-2), (out_bf16, ref)

    print("KERNEL_OK")
</pallas_src>

<mosaic_0001>
module attributes {stable_mosaic.version = 11 : i64} {
  func.func @gcn_pool_kernel(%arg0: i32, %arg1: memref<2x16x16xf32, #tpu.memory_space<vmem>>, %arg2: memref<2x16x8xf32, #tpu.memory_space<vmem>>, %arg3: memref<8x32xf32, #tpu.memory_space<vmem>>, %arg4: memref<1x32xf32, #tpu.memory_space<vmem>>, %arg5: memref<2x32xf32, #tpu.memory_space<vmem>>) attributes {dimension_semantics = [#tpu.dimension_semantics<parallel>], iteration_bounds = array<i64: 1>, scalar_prefetch = 0 : i64, scratch_operands = 0 : i64, tpu.core_type = #tpu.core_type<tc>, window_params = [{transform_indices = @transform_0, window_bounds = array<i64: 2, 16, 16>}, {transform_indices = @transform_1, window_bounds = array<i64: 2, 16, 8>}, {pipeline_mode = #tpu.pipeline_mode<synchronous>, transform_indices = @transform_2, window_bounds = array<i64: 8, 32>}, {pipeline_mode = #tpu.pipeline_mode<synchronous>, transform_indices = @transform_3, window_bounds = array<i64: 1, 32>}, {transform_indices = @transform_4, window_bounds = array<i64: 2, 32>}]} {
    %c0 = arith.constant 0 : index
    %c0_0 = arith.constant 0 : index
    %c0_1 = arith.constant 0 : index
    %0 = vector.load %arg1[%c0, %c0_0, %c0_1] : memref<2x16x16xf32, #tpu.memory_space<vmem>>, vector<2x16x16xf32>
    %c0_2 = arith.constant 0 : index
    %c0_3 = arith.constant 0 : index
    %c0_4 = arith.constant 0 : index
    %1 = vector.load %arg2[%c0_2, %c0_3, %c0_4] : memref<2x16x8xf32, #tpu.memory_space<vmem>>, vector<2x16x8xf32>
    %c0_5 = arith.constant 0 : index
    %c0_6 = arith.constant 0 : index
    %2 = vector.load %arg3[%c0_5, %c0_6] : memref<8x32xf32, #tpu.memory_space<vmem>>, vector<8x32xf32>
    %c0_7 = arith.constant 0 : index
    %c0_8 = arith.constant 0 : index
    %3 = vector.load %arg4[%c0_7, %c0_8] : memref<1x32xf32, #tpu.memory_space<vmem>>, vector<1x32xf32>
    "tpu.trace_start"() <{level = 10 : i32, message = "bnm,bmd->bnd"}> : () -> ()
    %cst = arith.constant dense<0.000000e+00> : vector<2x16x8xf32>
    %4 = tpu.matmul %0, %1, %cst {dimension_numbers = #tpu.dot_dimension_numbers<[2], [1], [1], [2], [0, 0, 0, 1, 1, 2], [0], [0]>} : vector<2x16x16xf32>, vector<2x16x8xf32>, vector<2x16x8xf32> -> vector<2x16x8xf32>
    "tpu.trace_stop"() : () -> ()
    %5 = vector.shape_cast %4 : vector<2x16x8xf32> to vector<32x8xf32>
    %cst_9 = arith.constant dense<0.000000e+00> : vector<32x32xf32>
    %6 = tpu.matmul %5, %2, %cst_9 {dimension_numbers = #tpu.dot_dimension_numbers<[1], [0], [0], [1], [0, 0, 1, 1], [], []>} : vector<32x8xf32>, vector<8x32xf32>, vector<32x32xf32> -> vector<32x32xf32>
    %7 = vector.broadcast %3 : vector<1x32xf32> to vector<32x32xf32>
    %8 = arith.addf %6, %7 : vector<32x32xf32>
    %cst_10 = arith.constant 0.000000e+00 : f32
    %9 = vector.broadcast %cst_10 : f32 to vector<32x32xf32>
    %10 = arith.maximumf %8, %9 : vector<32x32xf32>
    %11 = vector.shape_cast %10 : vector<32x32xf32> to vector<2x16x32xf32>
    %cst_11 = arith.constant dense<0.000000e+00> : vector<2x32xf32>
    %12 = vector.multi_reduction <add>, %11, %cst_11 [1] : vector<2x16x32xf32> to vector<2x32xf32>
    %cst_12 = arith.constant 1.600000e+01 : f32
    %13 = vector.broadcast %cst_12 : f32 to vector<2x32xf32>
    %14 = arith.divf %12, %13 : vector<2x32xf32>
    %c0_13 = arith.constant 0 : index
    %c0_14 = arith.constant 0 : index
    %15 = vector.load %arg5[%c0_13, %c0_14] : memref<2x32xf32, #tpu.memory_space<vmem>>, vector<2x32xf32>
    tpu.vector_store %arg5[%c0_13, %c0_14], %14 {strides = array<i32>} : memref<2x32xf32, #tpu.memory_space<vmem>>, vector<2x32xf32>,
    return
  }
  func.func @transform_0(%arg0: i32) -> (i32, i32, i32) {
    %c0_i32 = arith.constant 0 : i32
    %c0_i32_0 = arith.constant 0 : i32
    %c0_i32_1 = arith.constant 0 : i32
    return %arg0, %c0_i32, %c0_i32_0 : i32, i32, i32
  }
  func.func @transform_1(%arg0: i32) -> (i32, i32, i32) {
    %c0_i32 = arith.constant 0 : i32
    %c0_i32_0 = arith.constant 0 : i32
    %c0_i32_1 = arith.constant 0 : i32
    return %arg0, %c0_i32, %c0_i32_0 : i32, i32, i32
  }
  func.func @transform_2(%arg0: i32) -> (i32, i32) {
    %c0_i32 = arith.constant 0 : i32
    %c0_i32_0 = arith.constant 0 : i32
    %c0_i32_1 = arith.constant 0 : i32
    return %c0_i32, %c0_i32_0 : i32, i32
  }
  func.func @transform_3(%arg0: i32) -> (i32, i32) {
    %c0_i32 = arith.constant 0 : i32
    %c0_i32_0 = arith.constant 0 : i32
    %c0_i32_1 = arith.constant 0 : i32
    return %c0_i32, %c0_i32_0 : i32, i32
  }
  func.func @transform_4(%arg0: i32) -> (i32, i32) {
    %c0_i32 = arith.constant 0 : i32
    %c0_i32_0 = arith.constant 0 : i32
    return %arg0, %c0_i32 : i32, i32
  }
}

</mosaic_0001>

<bundles_post_ra>
// kernel: tpu_custom_call.1
= control target key start
LH: loop header
LB: loop body
LE: loop exit
PB: predicated region body
PF: predicated region fallthrough
CT: control target
= control target key end

     0   :  { %9 = vsyncpa [#allocation3], 0  ;;  %s676_s0 = inlined_call_operand.hbm [shape: f32[2,16,16], index: 0, kind: input, shape index: {}]   ;;  %s677_s1 = inlined_call_operand.hbm [shape: f32[2,16,8], index: 1, kind: input, shape index: {}]   ;;  %s678_s2 = inlined_call_operand.hbm [shape: f32[8,32], index: 2, kind: input, shape index: {}]   ;;  %s679_s3 = inlined_call_operand.hbm [shape: f32[1,32], index: 3, kind: input, shape index: {}]   ;;  %s680_s4 = inlined_call_operand.hbm [shape: f32[2,32], index: 4, kind: output, shape index: {}]  }
   0x1   :  { %10 = vsyncpa [#allocation6], 0 }
   0x2   :  { %11 = vsyncpa [#allocation9], 0 }
   0x3   :  { %12 = vsyncpa [#allocation4], 0  ;;  %s573_s15 = smov [#allocation5]   ;;  %s574_s17 = smov [#allocation2]  }
   0x4   :  { %s30_s16 = sshll.u32 %s573_s15, 4  ;;  %s18_s18 = sshll.u32 %s574_s17, 4  ;;  %s31_s16 = int_to_ptr.vmem [resolvable:$true] %s30_s16  ;;  %s605_s18 = int_to_ptr.vmem [resolvable:$true] %s18_s18 }
   0x5   :  { %s455_s21 = scalar_lea.hbm %s677_s1, 512 }
   0x6   :  { %p456_p0 = scmp.ne.s32.totalorder %s677_s1, %s455_s21  ;;  %p459_p1 = scmp.lt.u32.totalorder %s455_s21, %s677_s1 }
   0x8   :  { %p461_p2 = pnand %p459_p1, %p456_p0 }
   0xa   :  { %464 = shalt.err (!%p461_p2)
}
   0xb   :  { %s465_s26 = scalar_lea.vmem %s31_s16, 512  ;;  %p470_p4 = scmp.lt.s32.totalorder %s31_s16, %s31_s16 }
   0xc   :  { %p466_p3 = scmp.ne.s32.totalorder %s31_s16, %s465_s26  ;;  %p471_p5 = scmp.lt.s32.totalorder %s465_s26, %s465_s26 }
   0xe   :  { %p472_p6 = por %p471_p5, %p470_p4 }
  0x10   :  { %p473_p7 = pnand %p472_p6, %p466_p3 }
  0x12   :  { %476 = shalt.err (!%p473_p7)
}
  0x13   :  { %s575_s27 = smov 128   ;;  %s576_s28 = smov 8  }
  0x14   :  { %36 = dma.hbm_to_vmem [thread:$0]  %s677_s1, 512, %s31_s16, [#allocation6], %s575_s27, %s575_s27, %s576_s28  }
  0x15   :  { %s477_s7 = scalar_lea.hbm %s676_s0, 512 }
  0x16   :  { %p478_p8 = scmp.ne.s32.totalorder %s676_s0, %s477_s7  ;;  %p481_p9 = scmp.lt.u32.totalorder %s477_s7, %s676_s0 }
  0x18   :  { %p483_p10 = pnand %p481_p9, %p478_p8 }
  0x1a   :  { %486 = shalt.err (!%p483_p10)
}
  0x1b   :  { %s487_s12 = scalar_lea.vmem %s605_s18, 512  ;;  %p492_p12 = scmp.lt.s32.totalorder %s605_s18, %s605_s18 }
  0x1c   :  { %p488_p11 = scmp.ne.s32.totalorder %s605_s18, %s487_s12  ;;  %p493_p13 = scmp.lt.s32.totalorder %s487_s12, %s487_s12 }
  0x1e   :  { %p494_p0 = por %p493_p13, %p492_p12 }
  0x20   :  { %p495_p1 = pnand %p494_p0, %p488_p11 }
  0x22   :  { %498 = shalt.err (!%p495_p1)
}
  0x23   :  { %24 = dma.hbm_to_vmem [thread:$0]  %s676_s0, 512, %s605_s18, [#allocation3], %s575_s27, %s575_s27, %s576_s28  }
  0x24   :  { %s577_s14 = smov [#allocation7]   ;;  %s578_s16 = smov [#allocation8]  }
  0x25   :  { %s43_s15 = sshll.u32 %s577_s14, 4  ;;  %s53_s17 = sshll.u32 %s578_s16, 4  ;;  %s44_s15 = int_to_ptr.vmem [resolvable:$true] %s43_s15  ;;  %s54_s17 = int_to_ptr.vmem [resolvable:$true] %s53_s17 }
  0x26   :  { %s499_s21 = scalar_lea.hbm %s678_s2, 128 }
  0x27   :  { %p500_p2 = scmp.ne.s32.totalorder %s678_s2, %s499_s21  ;;  %p503_p3 = scmp.lt.u32.totalorder %s499_s21, %s678_s2 }
  0x29   :  { %p505_p4 = pnand %p503_p3, %p500_p2 }
  0x2b   :  { %508 = shalt.err (!%p505_p4)
}
  0x2c   :  { %s509_s0 = scalar_lea.vmem %s44_s15, 128  ;;  %p514_p6 = scmp.lt.s32.totalorder %s44_s15, %s44_s15 }
  0x2d   :  { %p510_p5 = scmp.ne.s32.totalorder %s44_s15, %s509_s0  ;;  %p515_p7 = scmp.lt.s32.totalorder %s509_s0, %s509_s0 }
  0x2f   :  { %p516_p8 = por %p515_p7, %p514_p6 }
  0x31   :  { %p517_p9 = pnand %p516_p8, %p510_p5 }
  0x33   :  { %520 = shalt.err (!%p517_p9)
}
  0x34   :  { %46 = dma.hbm_to_vmem [thread:$0]  %s678_s2, 128, %s44_s15, [#allocation6]  }
  0x35   :  { %s521_s29 = scalar_lea.hbm %s679_s3, 16 }
  0x36   :  { %p522_p10 = scmp.ne.s32.totalorder %s679_s3, %s521_s29  ;;  %p525_p11 = scmp.lt.u32.totalorder %s521_s29, %s679_s3 }
  0x38   :  { %p527_p12 = pnand %p525_p11, %p522_p10 }
  0x3a   :  { %530 = shalt.err (!%p527_p12)
}
  0x3b   :  { %s531_s8 = scalar_lea.vmem %s54_s17, 16  ;;  %s535_s9 = scalar_lea.vmem %s54_s17, 32 }
  0x3c   :  { %p532_p13 = scmp.ne.s32.totalorder %s54_s17, %s531_s8  ;;  %p536_p0 = scmp.lt.s32.totalorder %s54_s17, %s54_s17 }
  0x3d   :  { %p537_p1 = scmp.lt.s32.totalorder %s535_s9, %s531_s8 }
  0x3f   :  { %p538_p2 = por %p537_p1, %p536_p0 }
  0x41   :  { %p539_p3 = pnand %p538_p2, %p532_p13 }
  0x43   :  { %542 = shalt.err (!%p539_p3)
}
  0x44   :  { %56 = dma.hbm_to_vmem [thread:$0]  %s679_s3, 16, %s54_s17, [#allocation9]  }
  0x45   :  { %565 = dma.done.wait [#allocation3], 512  }
  0x46   :  { %566 = vsyncadd [#allocation3], 4294966784 }
  0x47   :  { %567 = dma.done.wait [#allocation6], 640  }
  0x48   :  { %568 = vsyncadd [#allocation6], 4294966656 }
  0x49   :  { %569 = dma.done.wait [#allocation9], 16  }
  0x4a   :  { %570 = vsyncadd [#allocation9], 4294967280  ;;  %vm79_vm0 = vcmask 130048   ;;  %v73_v0 = vld [vmem:[#allocation5] sm:$0xff]  ;;  %v74_v1 = vld [vmem:[#allocation5 + $0x8] sm:$0xff]  ;;  %vm248_vm1 = vcmask 64512  }
  0x4b   :  { %v69_v2 = vld [vmem:[#allocation2] sm:$0xff]  ;;  %v440_v3 = vpack.c.bf16 %v74_v1, %v73_v0  ;;  %v75_v4 = vld [vmem:[#allocation5 + $0x10] sm:$0xff]  ;;  %v76_v5 = vld [vmem:[#allocation5 + $0x18] sm:$0xff]  ;;  %vm350_vm2 = vcmask 261120   ;;  %s579_s3 = smov [#allocation10]   ;;  %vm374_vm3 = vcmask 1041409  }
  0x4c   :  { %422 = vmatprep.mubr.msk.f32.mxu1 %vm79_vm0, %v69_v2  ;;  %v444_v6 = vpack.c.bf16 %v76_v5, %v75_v4  ;;  %v70_v7 = vld [vmem:[#allocation2 + $0x8] sm:$0xff]  ;;  %v71_v8 = vld [vmem:[#allocation2 + $0x10] sm:$0xff]  ;;  %v72_v9 = vld [vmem:[#allocation2 + $0x18] sm:$0xff]  ;;  %s385_s11 = sshll.u32 %s579_s3, 4  ;;  %vm377_vm4 = vcmask 254976   ;;  %s386_s11 = int_to_ptr.vmem [resolvable:$true] %s385_s11 }
  0x4d   :  { %441 = vmatprep.subr.bf16.mxu1 %v440_v3  ;;  %v77_v10 = vld [vmem:[#allocation7] sm:$0xff]  ;;  %v400_v15 = vld [vmem:[#allocation8] ss:$0 sm:$0xff]  ;;  %s543_s12 = scalar_lea.vmem %s386_s11, 32  ;;  %p548_p5 = scmp.lt.s32.totalorder %s386_s11, %s386_s11 }
  0x4e   :  { %443 = vmatpush3.bf16.msra.mxu1 %v440_v3  ;;  %432 = vmatprep.subr.mxu0 %v77_v10  ;;  %p544_p4 = scmp.ne.s32.totalorder %s386_s11, %s543_s12  ;;  %p549_p6 = scmp.lt.s32.totalorder %s543_s12, %s543_s12 }
  0x4f   :  { %445 = vmatprep.subr.bf16.mxu1 %v444_v6  ;;  %433 = vmatpush3.msra.mxu0 %v77_v10 }
  0x50   :  { %p550_p7 = por %p549_p6, %p548_p5 }
  0x51   :  { %423 = vmatmul.mubr.msk.f32.vlgmr.msra.gmra.mrb[0].mxu1 %vm79_vm0, %v70_v7 }
  0x52   :  { %447 = vmatpush3.bf16.msra.mxu1 %v444_v6  ;;  %429 = vmatprep.mubr.msk.f32.mxu1 %vm79_vm0, %v71_v8  ;;  %p551_p8 = pnand %p550_p7, %p544_p4 }
  0x55   :  { %430 = vmatmul.mubr.msk.f32.vlgmr.msra.gmra.mrb[2].mxu1 %vm79_vm0, %v72_v9 }
 0x124   :  { %v424_v11 = vpop.f32.mrb[0].mxu1 }
 0x125   :  { %v152_v12 = vpop.f32.mrb[1].mxu1 }
 0x126   :  { %434 = vmatprep.mubr.msk.f32.mxu0 %vm248_vm1, %v152_v12 }
 0x127   :  { %435 = vmatmul.mubr.msk.f32.vlgmr.msra.gmra.mrb[0].mxu0 %vm248_vm1, %v424_v11 }
 0x128   :  { %v431_v13 = vpop.f32.mrb[2].mxu1 }
 0x129   :  { %v233_v14 = vpop.f32.mrb[3].mxu1 }
 0x12a   :  { %437 = vmatprep.mubr.msk.f32.mxu0 %vm248_vm1, %v233_v14 }
 0x12b   :  { %438 = vmatmul.mubr.msk.f32.gmra.mrb[2].mxu0 %vm248_vm1, %v431_v13 }
 0x1fa   :  { %v436_v16 = vpop.f32.mrb[0].mxu0 }
 0x1fb   :  { %v333_v17 = vadd.f32 %v436_v16, %v400_v15  ;;  %v327_v18 = vpop.f32.mrb[1].mxu0 }
 0x1fc   :  { %v328_v19 = vadd.f32 %v400_v15, %v327_v18 }
 0x1fd   :  { %v347_v20 = vmax.f32 %v333_v17, 0.0 }
 0x1fe   :  { %v346_v21 = vmax.f32 %v328_v19, 0.0  ;;  %v439_v22 = vpop.f32.mrb[2].mxu0 }
 0x1ff   :  { %v352_v23 = vsel %vm350_vm2, %v347_v20, 0.0  ;;  %v343_v24 = vadd.f32 %v439_v22, %v400_v15  ;;  %v337_v25 = vpop.f32.mrb[3].mxu0 }
 0x200   :  { %v351_v26 = vsel %vm350_vm2, %v346_v21, 0.0  ;;  %v338_v27 = vadd.f32 %v400_v15, %v337_v25 }
 0x201   :  { %v353_v28 = vadd.f32 %v352_v23, %v351_v26  ;;  %v349_v29 = vmax.f32 %v343_v24, 0.0 }
 0x202   :  { %v348_v30 = vmax.f32 %v338_v27, 0.0 }
 0x203   :  { %v354_v31 = vrot.slane %v353_v28, 4  ;;  %v361_v32 = vsel %vm350_vm2, %v349_v29, 0.0 }
 0x204   :  { %v360_v33 = vsel %vm350_vm2, %v348_v30, 0.0 }
 0x205   :  { %v355_v34 = vadd.f32 %v354_v31, %v353_v28  ;;  %v362_v35 = vadd.f32 %v361_v32, %v360_v33 }
 0x207   :  { %v356_v36 = vrot.slane %v355_v34, 2  ;;  %v363_v37 = vrot.slane %v362_v35, 4 }
 0x209   :  { %v357_v38 = vadd.f32 %v356_v36, %v355_v34  ;;  %v364_v39 = vadd.f32 %v363_v37, %v362_v35 }
 0x20b   :  { %v358_v40 = vrot.slane %v357_v38, 1  ;;  %v365_v41 = vrot.slane %v364_v39, 2 }
 0x20d   :  { %v366_v42 = vadd.f32 %v365_v41, %v364_v39  ;;  %v359_v44 = vadd.f32 %v358_v40, %v357_v38 }
 0x20f   :  { %v367_v43 = vrot.slane %v366_v42, 1  ;;  %v370_v46 = vmul.f32 0.0625, %v359_v44 }
 0x211   :  { %v368_v45 = vadd.f32 %v367_v43, %v366_v42 }
 0x213   :  { %v371_v47 = vmul.f32 0.0625, %v368_v45 }
 0x215   :  { %v375_v48 = vsel %vm374_vm3, %v371_v47, %v370_v46 }
 0x216   :  { %378 = vst.msk [vmem:[#allocation10] sm:$0x3] %vm377_vm4, %v375_v48 }
 0x217   :  { %554 = shalt.err (!%p551_p8)
}
 0x218   :  { %s555_s14 = scalar_lea.hbm %s680_s4, 32 }
 0x219   :  { %p556_p9 = scmp.ne.s32.totalorder %s680_s4, %s555_s14  ;;  %p559_p10 = scmp.lt.u32.totalorder %s555_s14, %s680_s4 }
 0x21b   :  { %p561_p11 = pnand %p559_p10, %p556_p9 }
 0x21d   :  { %564 = shalt.err (!%p561_p11)
}
 0x21e   :  { %388 = dma.vmem_to_hbm [thread:$0]  %s386_s11, 32, %s680_s4, [#allocation4]  }
 0x21f   :  { %571 = dma.done.wait [#allocation4], 32  }
 0x220   :  { %572 = vsyncadd [#allocation4], 4294967264 }
 0x221   :  { %392 = vsyncpa [#allocation3], 1 }
 0x222   :  { %393 = vsyncpa [#allocation6], 1 }
 0x223   :  { %394 = vsyncpa [#allocation9], 1 }
 0x224   :  { %395 = vsyncpa [#allocation4], 1 }

</bundles_post_ra>
